<compile_context>
chip_gen: v6e
topology: v6e:2x2x1
jax: 0.10.0
libtpu: 0.0.40
codegen_flags: <defaults>
</compile_context>

<pallas_src>
import functools

import jax
import jax.numpy as jnp
from jax import lax
from jax.experimental import pallas as pl
from jax.experimental.pallas import tpu as pltpu


def _round_up(x, m):
    return ((x + m - 1) // m) * m


def _smooth_l1(x):
    # F.smooth_l1_loss with default beta=1.0, per-element.
    ax = jnp.abs(x)
    return jnp.where(ax < 1.0, 0.5 * x * x, ax - 0.5)


# ---------------------------------------------------------------------------
# Kernel A: per-anchor work, tiled over the prior (lane) axis.
#   - masked smooth-L1 partial sums (loc / landm) per batch row
#   - num_pos / num_pos_landm per batch row
#   - per-anchor classification loss  lse(conf) - conf[target]
# Row statistics accumulate into resident (N,1) outputs (constant index_map,
# init at grid step 0); this axis must stay "arbitrary".
# TODO(synk): sublane fill at small N (4/10/C/N second-to-last dims) could be
# improved by folding the component axis into batch, but kernel A is not the
# bottleneck.
# ---------------------------------------------------------------------------
def _per_anchor_kernel(loc_d_ref, loc_t_ref, ldm_d_ref, ldm_t_ref,
                       conf_ref, conf_t_ref,
                       loss_c_ref, npos_ref, nposl_ref, lloc_ref, lldm_ref,
                       *, num_valid):
    p = pl.program_id(0)

    @pl.when(p == 0)
    def _init():
        npos_ref[...] = jnp.zeros_like(npos_ref)
        nposl_ref[...] = jnp.zeros_like(nposl_ref)
        lloc_ref[...] = jnp.zeros_like(lloc_ref)
        lldm_ref[...] = jnp.zeros_like(lldm_ref)

    conf_t = conf_t_ref[...]                      # (N, TP) int32
    pos = conf_t != 0                             # matched anchors
    pos1 = conf_t > 0                             # matched anchors w/ landmarks
    posf = pos.astype(jnp.float32)
    pos1f = pos1.astype(jnp.float32)

    # masked smooth-L1, reduced to per-row partial sums
    l_loc = _smooth_l1(loc_d_ref[...] - loc_t_ref[...]) * posf[:, None, :]
    l_ldm = _smooth_l1(ldm_d_ref[...] - ldm_t_ref[...]) * pos1f[:, None, :]
    lloc_ref[...] += jnp.sum(jnp.sum(l_loc, axis=1), axis=-1, keepdims=True)
    lldm_ref[...] += jnp.sum(jnp.sum(l_ldm, axis=1), axis=-1, keepdims=True)
    npos_ref[...] += jnp.sum(posf, axis=-1, keepdims=True)
    nposl_ref[...] += jnp.sum(pos1f, axis=-1, keepdims=True)

    # per-anchor classification loss: log_sum_exp(conf) - conf[target]
    conf = conf_ref[...]                          # (N, C, TP)
    n_cls = conf.shape[1]
    if n_cls == 2:                                # RetinaFace: background / face
        c0 = conf[:, 0, :]
        c1 = conf[:, 1, :]
        m = jnp.maximum(c0, c1)
        lse = m + jnp.log(jnp.exp(c0 - m) + jnp.exp(c1 - m))
        gathered = jnp.where(pos, c1, c0)         # conf_t[pos] = 1, background = 0
    else:                                         # generic (small C) fallback
        m = jnp.max(conf, axis=1)
        lse = m + jnp.log(jnp.sum(jnp.exp(conf - m[:, None, :]), axis=1))
        tgt = jnp.where(pos, 1, conf_t)
        cls = jax.lax.broadcasted_iota(jnp.int32, conf.shape, 1)
        gathered = jnp.sum(jnp.where(cls == tgt[:, None, :], conf, 0.0), axis=1)
    loss_c_all = lse - gathered                   # >= 0 always

    if num_valid is not None:                     # zero padded priors exactly
        tp = conf_t.shape[1]
        lane = jax.lax.broadcasted_iota(jnp.int32, conf_t.shape, 1)
        valid = (p * tp + lane) < num_valid
        loss_c_all = jnp.where(valid, loss_c_all, 0.0)

    loss_c_ref[...] = loss_c_all


# ---------------------------------------------------------------------------
# Kernel B: hard negative mining.  Grid = (n_j,) only; loss_c / conf_t full
# rows are VMEM-resident (constant index_map).  For the j-th output tile:
#   rank[j] = #{k : mined[k] > mined[j]} + #{k : mined[k] == mined[j], k < j}
# computed as:   below-chunks (k<j): >=     diagonal chunk: per-element tie
#                above-chunks (k>j): >
# The (N, TK, TJ) 0/1 slab is reduced over k on the MXU (bf16 ones, f32 acc).
# Padded priors have loss_c == 0 and conf_t == 0 (mined == 0), which cannot
# raise any real anchor's rank (real mined >= 0, padded indices are largest)
# and contribute 0 if selected, so no explicit masking is needed here.
# ---------------------------------------------------------------------------
def _mining_kernel(loss_c_ref, conf_t_ref, num_neg_ref, sel_loss_ref, rank_ref,
                   *, tile_j, tile_k, use_mxu):
    j = pl.program_id(0)
    n_batch, p_len = loss_c_ref.shape
    n_k = p_len // tile_k                          # static

    j_start = pl.multiple_of(j * tile_j, tile_j)
    loss_c_j = loss_c_ref[:, pl.ds(j_start, tile_j)]
    conf_t_j = conf_t_ref[:, pl.ds(j_start, tile_j)]
    pos_j = conf_t_j != 0
    mined_j = jnp.where(pos_j, 0.0, loss_c_j)      # (N, TJ)
    lj = mined_j[:, None, :]                       # (N, 1, TJ)

    # bf16 ones for the MXU rank reduction (0/1 counts are exact in bf16).
    ones_m = jnp.ones((n_batch, 8, tile_k), jnp.bfloat16) if use_mxu else None

    def _reduce_k(cnt):                            # (N, TK, TJ) bool -> (N, TJ) f32
        if use_mxu:
            part = jnp.einsum('nmk,nkj->nmj', ones_m, cnt.astype(jnp.bfloat16),
                              preferred_element_type=jnp.float32)
            return part[:, 0, :]
        return jnp.sum(cnt.astype(jnp.float32), axis=1)

    def _chunk_rank(c, strict):
        k_start = pl.multiple_of(c * tile_k, tile_k)
        l_k = loss_c_ref[:, pl.ds(k_start, tile_k)]
        t_k = conf_t_ref[:, pl.ds(k_start, tile_k)]
        mined_k = jnp.where(t_k != 0, 0.0, l_k)    # (N, TK)
        lk = mined_k[:, :, None]                   # (N, TK, 1)
        cnt = (lk > lj) if strict else (lk >= lj)  # single compare per element
        return _reduce_k(cnt)

    rank_ref[...] = jnp.zeros_like(rank_ref)

    def _below(c, carry):      # chunks fully below the j tile: ties count (k < j)
        rank_ref[...] += _chunk_rank(c, strict=False)
        return carry
    lax.fori_loop(0, j, _below, 0)

    # diagonal chunk (c == j, tile_k == tile_j): per-element tie-break with a
    # static strictly-lower-triangular mask (only chunk paying the extra ops).
    lk_d = mined_j[:, :, None]                     # (N, TJ, 1)
    tri = (jax.lax.broadcasted_iota(jnp.int32, (tile_j, tile_j), 0)
           < jax.lax.broadcasted_iota(jnp.int32, (tile_j, tile_j), 1))[None, :, :]
    rank_ref[...] += _reduce_k(jnp.where(tri, lk_d >= lj, lk_d > lj))

    def _above(c, carry):      # chunks fully above the j tile: strict >
        rank_ref[...] += _chunk_rank(c, strict=True)
        return carry
    lax.fori_loop(j + 1, n_k, _above, 0)

    neg = rank_ref[...] < num_neg_ref[...]         # (N, TJ) < (N, 1)
    sel = jnp.logical_or(pos_j, neg)
    sel_loss_ref[...] = jnp.where(sel, loss_c_j, 0.0)


def multibox_loss(loc_data, conf_data, landm_data, loc_t, conf_t, landm_t,
                  *, negpos_ratio=7, tile_p=2048, tile_m=512,
                  use_mxu_rank=True):
    """Pallas TPU MultiBoxLoss.forward (post-match part).

    loc_data (N,P,4), conf_data (N,P,C), landm_data (N,P,10), loc_t (N,P,4),
    conf_t (N,P) int, landm_t (N,P,10).  Returns (loss_l, loss_c, loss_landm).
    """
    N, P, _ = loc_data.shape
    C = conf_data.shape[-1]

    # ---- tile sizing ---------------------------------------------------------
    # keep kernel B's (N, TK, TJ) compare slab to a few MB of VMEM temporaries
    while N * tile_m * tile_m * 8 > (12 << 20) and tile_m > 128:
        tile_m //= 2
    tile_m = _round_up(min(tile_m, _round_up(P, 128)), 128)
    # tile_m | tile_p  =>  kernel A's padding always covers kernel B's
    tile_p = _round_up(min(max(tile_p, tile_m), _round_up(P, tile_m)), tile_m)
    p_pad_a = _round_up(P, tile_p)   # kernel A padding (linear work only)
    p_pad_b = _round_up(P, tile_m)   # kernel B padding (quadratic work), <= p_pad_a

    # ---- lane-dense layout: put the prior axis last (lane axis) --------------
    loc_d = jnp.transpose(loc_data.astype(jnp.float32), (0, 2, 1))    # (N,4,P)
    loc_tt = jnp.transpose(loc_t.astype(jnp.float32), (0, 2, 1))
    ldm_d = jnp.transpose(landm_data.astype(jnp.float32), (0, 2, 1))  # (N,10,P)
    ldm_tt = jnp.transpose(landm_t.astype(jnp.float32), (0, 2, 1))
    conf_d = jnp.transpose(conf_data.astype(jnp.float32), (0, 2, 1))  # (N,C,P)
    conf_ti = conf_t.astype(jnp.int32)                                # (N,P)

    if p_pad_a != P:
        pad3 = ((0, 0), (0, 0), (0, p_pad_a - P))
        loc_d, loc_tt = jnp.pad(loc_d, pad3), jnp.pad(loc_tt, pad3)
        ldm_d, ldm_tt = jnp.pad(ldm_d, pad3), jnp.pad(ldm_tt, pad3)
        conf_d = jnp.pad(conf_d, pad3)
        conf_ti = jnp.pad(conf_ti, ((0, 0), (0, p_pad_a - P)))  # padded = background

    vmem_limit = 32 * 1024 * 1024   # resident blocks are tiny; safe on v5e/v6e/v7x

    # ---- kernel A: per-anchor losses + per-row statistics --------------------
    kernel_a = functools.partial(
        _per_anchor_kernel, num_valid=P if p_pad_a != P else None)
    outs = pl.pallas_call(
        kernel_a,
        grid=(p_pad_a // tile_p,),
        in_specs=[
            pl.BlockSpec((N, 4, tile_p), lambda p: (0, 0, p)),
            pl.BlockSpec((N, 4, tile_p), lambda p: (0, 0, p)),
            pl.BlockSpec((N, 10, tile_p), lambda p: (0, 0, p)),
            pl.BlockSpec((N, 10, tile_p), lambda p: (0, 0, p)),
            pl.BlockSpec((N, C, tile_p), lambda p: (0, 0, p)),
            pl.BlockSpec((N, tile_p), lambda p: (0, p)),
        ],
        out_specs=[
            pl.BlockSpec((N, tile_p), lambda p: (0, p)),   # loss_c_all
            pl.BlockSpec((N, 1), lambda p: (0, 0)),        # num_pos / row
            pl.BlockSpec((N, 1), lambda p: (0, 0)),        # num_pos_landm / row
            pl.BlockSpec((N, 1), lambda p: (0, 0)),        # loc smooth-L1 / row
            pl.BlockSpec((N, 1), lambda p: (0, 0)),        # landm smooth-L1 / row
        ],
        out_shape=[
            jax.ShapeDtypeStruct((N, p_pad_a), jnp.float32),
            jax.ShapeDtypeStruct((N, 1), jnp.float32),
            jax.ShapeDtypeStruct((N, 1), jnp.float32),
            jax.ShapeDtypeStruct((N, 1), jnp.float32),
            jax.ShapeDtypeStruct((N, 1), jnp.float32),
        ],
        compiler_params=pltpu.CompilerParams(
            dimension_semantics=("arbitrary",),    # (N,1) outputs accumulate
            vmem_limit_bytes=vmem_limit),
    )(loc_d, loc_tt, ldm_d, ldm_tt, conf_d, conf_ti)
    loss_c_all, npos_rows, nposl_rows, lloc_rows, lldm_rows = outs

    # num_neg per row (clamp uses the TRUE prior count, not the padded one)
    num_neg = jnp.minimum(negpos_ratio * npos_rows, jnp.float32(P - 1))  # (N,1)

    # kernel B works on the minimal quadratic padding
    loss_c_b = loss_c_all[:, :p_pad_b]
    conf_t_b = conf_ti[:, :p_pad_b]

    # ---- kernel B: O(P^2) hard negative mining, k collapsed into the kernel --
    kernel_b = functools.partial(_mining_kernel, tile_j=tile_m, tile_k=tile_m,
                                 use_mxu=use_mxu_rank)
    sel_loss = pl.pallas_call(
        kernel_b,
        grid=(p_pad_b // tile_m,),
        in_specs=[
            pl.BlockSpec((N, p_pad_b), lambda j: (0, 0)),  # loss_c, resident row
            pl.BlockSpec((N, p_pad_b), lambda j: (0, 0)),  # conf_t, resident row
            pl.BlockSpec((N, 1), lambda j: (0, 0)),        # num_neg per row
        ],
        out_specs=pl.BlockSpec((N, tile_m), lambda j: (0, j)),
        out_shape=jax.ShapeDtypeStruct((N, p_pad_b), jnp.float32),
        scratch_shapes=[pltpu.VMEM((N, tile_m), jnp.float32)],  # rank accumulator
        compiler_params=pltpu.CompilerParams(
            dimension_semantics=("parallel",),     # shards j across v7x cores
            vmem_limit_bytes=vmem_limit),
    )(loss_c_b, conf_t_b, num_neg)

    # ---- tiny scalar finalization (a handful of XLA ops) ----------------------
    n = jnp.maximum(jnp.sum(npos_rows), 1.0)
    n1 = jnp.maximum(jnp.sum(nposl_rows), 1.0)
    loss_l = jnp.sum(lloc_rows) / n
    loss_c = jnp.sum(sel_loss) / n
    loss_landm = jnp.sum(lldm_rows) / n1
    return loss_l, loss_c, loss_landm


# ---------------------------------------------------------------------------
# Pure-JAX reference (same math as the torch module, dense masks) for testing.
# ---------------------------------------------------------------------------
def _multibox_losses_ref(loc_d, conf_d, landm_d, loc_t, conf_t, landm_t,
                         negpos_ratio):
    N, P, C = conf_d.shape

    pos1 = conf_t > 0
    n1 = jnp.maximum(jnp.sum(pos1).astype(jnp.float32), 1.0)
    loss_landm = jnp.sum(_smooth_l1(landm_d - landm_t)
                         * pos1[:, :, None].astype(jnp.float32))

    pos = conf_t != 0
    conf_t_mod = jnp.where(pos, 1, conf_t)
    loss_l = jnp.sum(_smooth_l1(loc_d - loc_t)
                     * pos[:, :, None].astype(jnp.float32))

    m = jnp.max(conf_d, axis=-1, keepdims=True)
    lse = jnp.log(jnp.sum(jnp.exp(conf_d - m), axis=-1)) + m[..., 0]
    cls = jax.lax.broadcasted_iota(jnp.int32, (N, P, C), 2)
    onehot = (cls == conf_t_mod[:, :, None]).astype(jnp.float32)
    gathered = jnp.sum(conf_d * onehot, axis=-1)
    loss_c_all = lse - gathered

    mined = jnp.where(pos, 0.0, loss_c_all)
    l_j = mined[:, :, None]
    l_k = mined[:, None, :]
    idx_j = jax.lax.broadcasted_iota(jnp.int32, (N, P, P), 1)
    idx_k = jax.lax.broadcasted_iota(jnp.int32, (N, P, P), 2)
    rank = jnp.sum((l_k > l_j).astype(jnp.int32)
                   + jnp.logical_and(l_k == l_j, idx_k < idx_j).astype(jnp.int32),
                   axis=2)
    num_pos = jnp.sum(pos.astype(jnp.int32), axis=1, keepdims=True)
    num_neg = jnp.minimum(negpos_ratio * num_pos, P - 1)
    neg = rank < num_neg
    selected = jnp.logical_or(pos, neg).astype(jnp.float32)
    loss_c = jnp.sum(loss_c_all * selected)

    n = jnp.maximum(jnp.sum(num_pos).astype(jnp.float32), 1.0)
    return loss_l / n, loss_c / n, loss_landm / n1


if __name__ == "__main__":
    N = 2          # batch
    P = 500        # num_priors (not a multiple of 128 -> exercises padding;
                   # real RetinaFace ~16800 also supported)
    C = 2          # num_classes (RetinaFace: background / face)
    NEG_POS = 7    # negpos_ratio

    key = jax.random.PRNGKey(0)
    k1, k2, k3, k4, k5, k6 = jax.random.split(key, 6)

    loc_data = jax.random.normal(k1, (N, P, 4), dtype=jnp.float32)
    conf_data = jax.random.normal(k2, (N, P, C), dtype=jnp.float32)
    landm_data = jax.random.normal(k3, (N, P, 10), dtype=jnp.float32)

    # Synthetic matched targets (what match()/encode() would produce).
    loc_t = jax.random.normal(k4, (N, P, 4), dtype=jnp.float32)
    landm_t = jax.random.normal(k5, (N, P, 10), dtype=jnp.float32)
    r = jax.random.uniform(k6, (N, P))
    # ~10% positives with landmarks (1), ~5% positives w/o landmarks (-1), rest bg
    conf_t = jnp.where(r < 0.10, 1, jnp.where(r < 0.15, -1, 0)).astype(jnp.int32)

    # small tiles so the demo exercises multi-step kernel A, multi-tile kernel B
    # (below / diagonal / above chunk paths) and the padded-prior handling.
    loss_l, loss_c, loss_landm = multibox_loss(
        loc_data, conf_data, landm_data, loc_t, conf_t, landm_t,
        negpos_ratio=NEG_POS, tile_p=256, tile_m=128)
    jax.block_until_ready((loss_l, loss_c, loss_landm))

    ref_l, ref_c, ref_landm = _multibox_losses_ref(
        loc_data, conf_data, landm_data, loc_t, conf_t, landm_t, NEG_POS)
    assert jnp.allclose(loss_l, ref_l, rtol=1e-3, atol=1e-3), (loss_l, ref_l)
    assert jnp.allclose(loss_c, ref_c, rtol=1e-3, atol=1e-3), (loss_c, ref_c)
    assert jnp.allclose(loss_landm, ref_landm, rtol=1e-3, atol=1e-3), (loss_landm, ref_landm)

    print("KERNEL_OK")
</pallas_src>

<mosaic_0001>
module attributes {stable_mosaic.version = 11 : i64} {
  func.func @_per_anchor_kernel(%arg0: i32, %arg1: memref<2x4x256xf32, #tpu.memory_space<vmem>>, %arg2: memref<2x4x256xf32, #tpu.memory_space<vmem>>, %arg3: memref<2x10x256xf32, #tpu.memory_space<vmem>>, %arg4: memref<2x10x256xf32, #tpu.memory_space<vmem>>, %arg5: memref<2x2x256xf32, #tpu.memory_space<vmem>>, %arg6: memref<2x256xi32, #tpu.memory_space<vmem>>, %arg7: memref<2x256xf32, #tpu.memory_space<vmem>>, %arg8: memref<2x1xf32, #tpu.memory_space<vmem>>, %arg9: memref<2x1xf32, #tpu.memory_space<vmem>>, %arg10: memref<2x1xf32, #tpu.memory_space<vmem>>, %arg11: memref<2x1xf32, #tpu.memory_space<vmem>>) attributes {dimension_semantics = [#tpu.dimension_semantics<arbitrary>], iteration_bounds = array<i64: 2>, scalar_prefetch = 0 : i64, scratch_operands = 0 : i64, tpu.core_type = #tpu.core_type<tc>, window_params = [{transform_indices = @transform_0, window_bounds = array<i64: 2, 4, 256>}, {transform_indices = @transform_1, window_bounds = array<i64: 2, 4, 256>}, {transform_indices = @transform_2, window_bounds = array<i64: 2, 10, 256>}, {transform_indices = @transform_3, window_bounds = array<i64: 2, 10, 256>}, {transform_indices = @transform_4, window_bounds = array<i64: 2, 2, 256>}, {transform_indices = @transform_5, window_bounds = array<i64: 2, 256>}, {transform_indices = @transform_6, window_bounds = array<i64: 2, 256>}, {pipeline_mode = #tpu.pipeline_mode<synchronous>, transform_indices = @transform_7, window_bounds = array<i64: 2, 1>}, {pipeline_mode = #tpu.pipeline_mode<synchronous>, transform_indices = @transform_8, window_bounds = array<i64: 2, 1>}, {pipeline_mode = #tpu.pipeline_mode<synchronous>, transform_indices = @transform_9, window_bounds = array<i64: 2, 1>}, {pipeline_mode = #tpu.pipeline_mode<synchronous>, transform_indices = @transform_10, window_bounds = array<i64: 2, 1>}]} {
    %c0_i32 = arith.constant 0 : i32
    %0 = arith.cmpi eq, %arg0, %c0_i32 : i32
    %1 = arith.extui %0 : i1 to i32
    %c0_i32_0 = arith.constant 0 : i32
    %2 = arith.cmpi ne, %1, %c0_i32_0 : i32
    scf.if %2 {
      %cst_49 = arith.constant 0.000000e+00 : f32
      %88 = vector.broadcast %cst_49 : f32 to vector<2x1xf32>
      %c0_50 = arith.constant 0 : index
      %c0_51 = arith.constant 0 : index
      %89 = vector.load %arg8[%c0_50, %c0_51] : memref<2x1xf32, #tpu.memory_space<vmem>>, vector<2x1xf32>
      tpu.vector_store %arg8[%c0_50, %c0_51], %88 {strides = array<i32>} : memref<2x1xf32, #tpu.memory_space<vmem>>, vector<2x1xf32>,
      %cst_52 = arith.constant 0.000000e+00 : f32
      %90 = vector.broadcast %cst_52 : f32 to vector<2x1xf32>
      %c0_53 = arith.constant 0 : index
      %c0_54 = arith.constant 0 : index
      %91 = vector.load %arg9[%c0_53, %c0_54] : memref<2x1xf32, #tpu.memory_space<vmem>>, vector<2x1xf32>
      tpu.vector_store %arg9[%c0_53, %c0_54], %90 {strides = array<i32>} : memref<2x1xf32, #tpu.memory_space<vmem>>, vector<2x1xf32>,
      %cst_55 = arith.constant 0.000000e+00 : f32
      %92 = vector.broadcast %cst_55 : f32 to vector<2x1xf32>
      %c0_56 = arith.constant 0 : index
      %c0_57 = arith.constant 0 : index
      %93 = vector.load %arg10[%c0_56, %c0_57] : memref<2x1xf32, #tpu.memory_space<vmem>>, vector<2x1xf32>
      tpu.vector_store %arg10[%c0_56, %c0_57], %92 {strides = array<i32>} : memref<2x1xf32, #tpu.memory_space<vmem>>, vector<2x1xf32>,
      %cst_58 = arith.constant 0.000000e+00 : f32
      %94 = vector.broadcast %cst_58 : f32 to vector<2x1xf32>
      %c0_59 = arith.constant 0 : index
      %c0_60 = arith.constant 0 : index
      %95 = vector.load %arg11[%c0_59, %c0_60] : memref<2x1xf32, #tpu.memory_space<vmem>>, vector<2x1xf32>
      tpu.vector_store %arg11[%c0_59, %c0_60], %94 {strides = array<i32>} : memref<2x1xf32, #tpu.memory_space<vmem>>, vector<2x1xf32>,
    } else {
    }
    %c0 = arith.constant 0 : index
    %c0_1 = arith.constant 0 : index
    %3 = vector.load %arg6[%c0, %c0_1] : memref<2x256xi32, #tpu.memory_space<vmem>>, vector<2x256xi32>
    %c0_i32_2 = arith.constant 0 : i32
    %4 = vector.broadcast %c0_i32_2 : i32 to vector<2x256xi32>
    %5 = arith.cmpi ne, %3, %4 : vector<2x256xi32>
    %c0_i32_3 = arith.constant 0 : i32
    %6 = vector.broadcast %c0_i32_3 : i32 to vector<2x256xi32>
    %7 = arith.cmpi sgt, %3, %6 : vector<2x256xi32>
    %8 = arith.extui %5 : vector<2x256xi1> to vector<2x256xi32>
    %9 = arith.sitofp %8 : vector<2x256xi32> to vector<2x256xf32>
    %10 = arith.extui %7 : vector<2x256xi1> to vector<2x256xi32>
    %11 = arith.sitofp %10 : vector<2x256xi32> to vector<2x256xf32>
    %c0_4 = arith.constant 0 : index
    %c0_5 = arith.constant 0 : index
    %c0_6 = arith.constant 0 : index
    %12 = vector.load %arg1[%c0_4, %c0_5, %c0_6] : memref<2x4x256xf32, #tpu.memory_space<vmem>>, vector<2x4x256xf32>
    %c0_7 = arith.constant 0 : index
    %c0_8 = arith.constant 0 : index
    %c0_9 = arith.constant 0 : index
    %13 = vector.load %arg2[%c0_7, %c0_8, %c0_9] : memref<2x4x256xf32, #tpu.memory_space<vmem>>, vector<2x4x256xf32>
    %14 = arith.subf %12, %13 : vector<2x4x256xf32>
    %15 = math.absf %14 : vector<2x4x256xf32>
    %cst = arith.constant 1.000000e+00 : f32
    %16 = vector.broadcast %cst : f32 to vector<2x4x256xf32>
    %17 = arith.cmpf olt, %15, %16 : vector<2x4x256xf32>
    %cst_10 = arith.constant 5.000000e-01 : f32
    %18 = vector.broadcast %cst_10 : f32 to vector<2x4x256xf32>
    %19 = arith.mulf %18, %14 : vector<2x4x256xf32>
    %20 = arith.mulf %19, %14 : vector<2x4x256xf32>
    %cst_11 = arith.constant 5.000000e-01 : f32
    %21 = vector.broadcast %cst_11 : f32 to vector<2x4x256xf32>
    %22 = arith.subf %15, %21 : vector<2x4x256xf32>
    %23 = arith.select %17, %20, %22 : vector<2x4x256xi1>, vector<2x4x256xf32>
    %24 = vector.shape_cast %9 : vector<2x256xf32> to vector<2x1x256xf32>
    %25 = vector.broadcast %24 : vector<2x1x256xf32> to vector<2x4x256xf32>
    %26 = arith.mulf %23, %25 : vector<2x4x256xf32>
    %c0_12 = arith.constant 0 : index
    %c0_13 = arith.constant 0 : index
    %c0_14 = arith.constant 0 : index
    %27 = vector.load %arg3[%c0_12, %c0_13, %c0_14] : memref<2x10x256xf32, #tpu.memory_space<vmem>>, vector<2x10x256xf32>
    %c0_15 = arith.constant 0 : index
    %c0_16 = arith.constant 0 : index
    %c0_17 = arith.constant 0 : index
    %28 = vector.load %arg4[%c0_15, %c0_16, %c0_17] : memref<2x10x256xf32, #tpu.memory_space<vmem>>, vector<2x10x256xf32>
    %29 = arith.subf %27, %28 : vector<2x10x256xf32>
    %30 = math.absf %29 : vector<2x10x256xf32>
    %cst_18 = arith.constant 1.000000e+00 : f32
    %31 = vector.broadcast %cst_18 : f32 to vector<2x10x256xf32>
    %32 = arith.cmpf olt, %30, %31 : vector<2x10x256xf32>
    %cst_19 = arith.constant 5.000000e-01 : f32
    %33 = vector.broadcast %cst_19 : f32 to vector<2x10x256xf32>
    %34 = arith.mulf %33, %29 : vector<2x10x256xf32>
    %35 = arith.mulf %34, %29 : vector<2x10x256xf32>
    %cst_20 = arith.constant 5.000000e-01 : f32
    %36 = vector.broadcast %cst_20 : f32 to vector<2x10x256xf32>
    %37 = arith.subf %30, %36 : vector<2x10x256xf32>
    %38 = arith.select %32, %35, %37 : vector<2x10x256xi1>, vector<2x10x256xf32>
    %39 = vector.shape_cast %11 : vector<2x256xf32> to vector<2x1x256xf32>
    %40 = vector.broadcast %39 : vector<2x1x256xf32> to vector<2x10x256xf32>
    %41 = arith.mulf %38, %40 : vector<2x10x256xf32>
    %c0_21 = arith.constant 0 : index
    %c0_22 = arith.constant 0 : index
    %42 = vector.load %arg10[%c0_21, %c0_22] : memref<2x1xf32, #tpu.memory_space<vmem>>, vector<2x1xf32>
    %cst_23 = arith.constant dense<0.000000e+00> : vector<2x256xf32>
    %43 = vector.multi_reduction <add>, %26, %cst_23 [1] : vector<2x4x256xf32> to vector<2x256xf32>
    %cst_24 = arith.constant dense<0.000000e+00> : vector<2xf32>
    %44 = vector.multi_reduction <add>, %43, %cst_24 [1] : vector<2x256xf32> to vector<2xf32>
    %45 = vector.shape_cast %44 : vector<2xf32> to vector<2x1xf32>
    %46 = arith.addf %42, %45 : vector<2x1xf32>
    %c0_25 = arith.constant 0 : index
    %c0_26 = arith.constant 0 : index
    %47 = vector.load %arg10[%c0_25, %c0_26] : memref<2x1xf32, #tpu.memory_space<vmem>>, vector<2x1xf32>
    tpu.vector_store %arg10[%c0_25, %c0_26], %46 {strides = array<i32>} : memref<2x1xf32, #tpu.memory_space<vmem>>, vector<2x1xf32>,
    %c0_27 = arith.constant 0 : index
    %c0_28 = arith.constant 0 : index
    %48 = vector.load %arg11[%c0_27, %c0_28] : memref<2x1xf32, #tpu.memory_space<vmem>>, vector<2x1xf32>
    %cst_29 = arith.constant dense<0.000000e+00> : vector<2x256xf32>
    %49 = vector.multi_reduction <add>, %41, %cst_29 [1] : vector<2x10x256xf32> to vector<2x256xf32>
    %cst_30 = arith.constant dense<0.000000e+00> : vector<2xf32>
    %50 = vector.multi_reduction <add>, %49, %cst_30 [1] : vector<2x256xf32> to vector<2xf32>
    %51 = vector.shape_cast %50 : vector<2xf32> to vector<2x1xf32>
    %52 = arith.addf %48, %51 : vector<2x1xf32>
    %c0_31 = arith.constant 0 : index
    %c0_32 = arith.constant 0 : index
    %53 = vector.load %arg11[%c0_31, %c0_32] : memref<2x1xf32, #tpu.memory_space<vmem>>, vector<2x1xf32>
    tpu.vector_store %arg11[%c0_31, %c0_32], %52 {strides = array<i32>} : memref<2x1xf32, #tpu.memory_space<vmem>>, vector<2x1xf32>,
    %c0_33 = arith.constant 0 : index
    %c0_34 = arith.constant 0 : index
    %54 = vector.load %arg8[%c0_33, %c0_34] : memref<2x1xf32, #tpu.memory_space<vmem>>, vector<2x1xf32>
    %cst_35 = arith.constant dense<0.000000e+00> : vector<2xf32>
    %55 = vector.multi_reduction <add>, %9, %cst_35 [1] : vector<2x256xf32> to vector<2xf32>
    %56 = vector.shape_cast %55 : vector<2xf32> to vector<2x1xf32>
    %57 = arith.addf %54, %56 : vector<2x1xf32>
    %c0_36 = arith.constant 0 : index
    %c0_37 = arith.constant 0 : index
    %58 = vector.load %arg8[%c0_36, %c0_37] : memref<2x1xf32, #tpu.memory_space<vmem>>, vector<2x1xf32>
    tpu.vector_store %arg8[%c0_36, %c0_37], %57 {strides = array<i32>} : memref<2x1xf32, #tpu.memory_space<vmem>>, vector<2x1xf32>,
    %c0_38 = arith.constant 0 : index
    %c0_39 = arith.constant 0 : index
    %59 = vector.load %arg9[%c0_38, %c0_39] : memref<2x1xf32, #tpu.memory_space<vmem>>, vector<2x1xf32>
    %cst_40 = arith.constant dense<0.000000e+00> : vector<2xf32>
    %60 = vector.multi_reduction <add>, %11, %cst_40 [1] : vector<2x256xf32> to vector<2xf32>
    %61 = vector.shape_cast %60 : vector<2xf32> to vector<2x1xf32>
    %62 = arith.addf %59, %61 : vector<2x1xf32>
    %c0_41 = arith.constant 0 : index
    %c0_42 = arith.constant 0 : index
    %63 = vector.load %arg9[%c0_41, %c0_42] : memref<2x1xf32, #tpu.memory_space<vmem>>, vector<2x1xf32>
    tpu.vector_store %arg9[%c0_41, %c0_42], %62 {strides = array<i32>} : memref<2x1xf32, #tpu.memory_space<vmem>>, vector<2x1xf32>,
    %c0_43 = arith.constant 0 : index
    %c0_44 = arith.constant 0 : index
    %c0_45 = arith.constant 0 : index
    %64 = vector.load %arg5[%c0_43, %c0_44, %c0_45] : memref<2x2x256xf32, #tpu.memory_space<vmem>>, vector<2x2x256xf32>
    %65 = vector.extract_strided_slice %64 {offsets = [0, 0, 0], sizes = [2, 1, 256], strides = [1, 1, 1]} : vector<2x2x256xf32> to vector<2x1x256xf32>
    %66 = vector.shape_cast %65 : vector<2x1x256xf32> to vector<2x256xf32>
    %67 = vector.extract_strided_slice %64 {offsets = [0, 1, 0], sizes = [2, 1, 256], strides = [1, 1, 1]} : vector<2x2x256xf32> to vector<2x1x256xf32>
    %68 = vector.shape_cast %67 : vector<2x1x256xf32> to vector<2x256xf32>
    %69 = arith.maximumf %66, %68 : vector<2x256xf32>
    %70 = arith.subf %66, %69 : vector<2x256xf32>
    %71 = math.exp %70 : vector<2x256xf32>
    %72 = arith.subf %68, %69 : vector<2x256xf32>
    %73 = math.exp %72 : vector<2x256xf32>
    %74 = arith.addf %71, %73 : vector<2x256xf32>
    %75 = math.log %74 : vector<2x256xf32>
    %76 = arith.addf %69, %75 : vector<2x256xf32>
    %77 = arith.select %5, %68, %66 : vector<2x256xi1>, vector<2x256xf32>
    %78 = arith.subf %76, %77 : vector<2x256xf32>
    %79 = tpu.iota {dimensions = array<i32: 1>} : vector<2x256xi32>
    %c256_i32 = arith.constant 256 : i32
    %80 = arith.muli %arg0, %c256_i32 : i32
    %81 = vector.broadcast %80 : i32 to vector<2x256xi32>
    %82 = arith.addi %81, %79 : vector<2x256xi32>
    %c500_i32 = arith.constant 500 : i32
    %83 = vector.broadcast %c500_i32 : i32 to vector<2x256xi32>
    %84 = arith.cmpi slt, %82, %83 : vector<2x256xi32>
    %cst_46 = arith.constant 0.000000e+00 : f32
    %85 = vector.broadcast %cst_46 : f32 to vector<2x256xf32>
    %86 = arith.select %84, %78, %85 : vector<2x256xi1>, vector<2x256xf32>
    %c0_47 = arith.constant 0 : index
    %c0_48 = arith.constant 0 : index
    %87 = vector.load %arg7[%c0_47, %c0_48] : memref<2x256xf32, #tpu.memory_space<vmem>>, vector<2x256xf32>
    tpu.vector_store %arg7[%c0_47, %c0_48], %86 {strides = array<i32>} : memref<2x256xf32, #tpu.memory_space<vmem>>, vector<2x256xf32>,
    return
  }
  func.func @transform_0(%arg0: i32) -> (i32, i32, i32) {
    %c0_i32 = arith.constant 0 : i32
    %c0_i32_0 = arith.constant 0 : i32
    %c0_i32_1 = arith.constant 0 : i32
    return %c0_i32, %c0_i32_0, %arg0 : i32, i32, i32
  }
  func.func @transform_1(%arg0: i32) -> (i32, i32, i32) {
    %c0_i32 = arith.constant 0 : i32
    %c0_i32_0 = arith.constant 0 : i32
    %c0_i32_1 = arith.constant 0 : i32
    return %c0_i32, %c0_i32_0, %arg0 : i32, i32, i32
  }
  func.func @transform_2(%arg0: i32) -> (i32, i32, i32) {
    %c0_i32 = arith.constant 0 : i32
    %c0_i32_0 = arith.constant 0 : i32
    %c0_i32_1 = arith.constant 0 : i32
    return %c0_i32, %c0_i32_0, %arg0 : i32, i32, i32
  }
  func.func @transform_3(%arg0: i32) -> (i32, i32, i32) {
    %c0_i32 = arith.constant 0 : i32
    %c0_i32_0 = arith.constant 0 : i32
    %c0_i32_1 = arith.constant 0 : i32
    return %c0_i32, %c0_i32_0, %arg0 : i32, i32, i32
  }
  func.func @transform_4(%arg0: i32) -> (i32, i32, i32) {
    %c0_i32 = arith.constant 0 : i32
    %c0_i32_0 = arith.constant 0 : i32
    %c0_i32_1 = arith.constant 0 : i32
    return %c0_i32, %c0_i32_0, %arg0 : i32, i32, i32
  }
  func.func @transform_5(%arg0: i32) -> (i32, i32) {
    %c0_i32 = arith.constant 0 : i32
    %c0_i32_0 = arith.constant 0 : i32
    return %c0_i32, %arg0 : i32, i32
  }
  func.func @transform_6(%arg0: i32) -> (i32, i32) {
    %c0_i32 = arith.constant 0 : i32
    %c0_i32_0 = arith.constant 0 : i32
    return %c0_i32, %arg0 : i32, i32
  }
  func.func @transform_7(%arg0: i32) -> (i32, i32) {
    %c0_i32 = arith.constant 0 : i32
    %c0_i32_0 = arith.constant 0 : i32
    %c0_i32_1 = arith.constant 0 : i32
    return %c0_i32, %c0_i32_0 : i32, i32
  }
  func.func @transform_8(%arg0: i32) -> (i32, i32) {
    %c0_i32 = arith.constant 0 : i32
    %c0_i32_0 = arith.constant 0 : i32
    %c0_i32_1 = arith.constant 0 : i32
    return %c0_i32, %c0_i32_0 : i32, i32
  }
  func.func @transform_9(%arg0: i32) -> (i32, i32) {
    %c0_i32 = arith.constant 0 : i32
    %c0_i32_0 = arith.constant 0 : i32
    %c0_i32_1 = arith.constant 0 : i32
    return %c0_i32, %c0_i32_0 : i32, i32
  }
  func.func @transform_10(%arg0: i32) -> (i32, i32) {
    %c0_i32 = arith.constant 0 : i32
    %c0_i32_0 = arith.constant 0 : i32
    %c0_i32_1 = arith.constant 0 : i32
    return %c0_i32, %c0_i32_0 : i32, i32
  }
}

</mosaic_0001>

<bundles_post_ra>
// kernel: tpu_custom_call.1
= control target key start
LH: loop header
LB: loop body
LE: loop exit
PB: predicated region body
PF: predicated region fallthrough
CT: control target
= control target key end

     0   :  { %s1928_s0 = inlined_call_operand.vmem [shape: f32[2,4,512], index: 0, kind: input, shape index: {}]   ;;  %s1929_s1 = inlined_call_operand.vmem [shape: f32[2,4,512], index: 1, kind: input, shape index: {}]   ;;  %s1930_s2 = inlined_call_operand.vmem [shape: f32[2,10,512], index: 2, kind: input, shape index: {}]   ;;  %s1931_s3 = inlined_call_operand.vmem [shape: f32[2,10,512], index: 3, kind: input, shape index: {}]   ;;  %s1932_s4 = inlined_call_operand.vmem [shape: f32[2,2,512], index: 4, kind: input, shape index: {}]   ;;  %s1933_s5 = inlined_call_operand.vmem [shape: s32[2,512], index: 5, kind: input, shape index: {}]   ;;  %s1934_s6 = inlined_call_operand.hbm [shape: f32[2,512], index: 6, kind: output, shape index: {0}]   ;;  %s1935_s7 = inlined_call_operand.vmem [shape: f32[2,1], index: 7, kind: output, shape index: {1}]   ;;  %s1936_s8 = inlined_call_operand.vmem [shape: f32[2,1], index: 8, kind: output, shape index: {2}]   ;;  %s1937_s9 = inlined_call_operand.vmem [shape: f32[2,1], index: 9, kind: output, shape index: {3}]   ;;  %s1938_s10 = inlined_call_operand.vmem [shape: f32[2,1], index: 10, kind: output, shape index: {4}]  }
   0x1   :  { %1942 = sst [smem:[#allocation12_spill]] %s1928_s0 }
   0x2   :  { %1943 = sst [smem:[#allocation13_spill]] %s1929_s1 }
   0x3   :  { %1944 = sst [smem:[#allocation14_spill]] %s1930_s2 }
   0x4   :  { %1945 = sst [smem:[#allocation15_spill]] %s1931_s3 }
   0x5   :  { %16 = vsyncpa [#allocation8], 0 }
   0x6   :  { %18 = vsyncpa [#allocation8 + $0x1], 0  ;;  %s1502_s13 = smov 0   ;;  %s1504_s14 = smov 0  }
   0x7   :  { %s1506_s15 = smov 0   ;;  %s1508_s16 = smov 0  }
   0x8 LB: > { %s1523_s17 = sadd.s32 4294967295, %s1440_s16   ;;  %s1269_s18 = sadd.s32 4294967294, %s1440_s16   ;;  %s1440_s16 = sphi %s1508_s16, %s1976_s16   ;;  %s1436_s15 = sphi %s1506_s15, %s1980_s15   ;;  %s1432_s14 = sphi %s1504_s14, %s1979_s14   ;;  %s1428_s13 = sphi %s1502_s13, %s1978_s13  }
   0x9   : > { %s1527_s19 = sadd.s32 1, %s1440_s16   ;;  %s31_s20 = sadd.s32 1, %s1436_s15 }
   0xa   : > { %1946 = sst [smem:[#allocation10_spill]] %s1527_s19  ;;  %s28_s21 = ssub.s32 %s1440_s16, %s1527_s19 }
   0xb   : > { %p38_p0 = scmp.ne.s32.totalorder %s1436_s15, %s1432_s14  ;;  %p29_p1 = scmp.eq.s32.totalorder %s28_s21, 0 }
   0xc   : > { %p39_p2 = scmp.eq.s32.totalorder %s1440_s16, 0  ;;  %p198_p3 = scmp.eq.s32.totalorder %s1523_s17, 1 }
   0xd   : > { %p203_p4 = scmp.ne.s32.totalorder %s1432_s14, %s1428_s13  ;;  %p204_p7 = scmp.eq.s32.totalorder %s1269_s18, 1 }
   0xe   : > { %s1539_s22 = scalar_select %p29_p1, %s1436_s15, %s31_s20  }
   0xf   : > { %p1541_p5 = por %p39_p2, %p38_p0  ;;  %p1545_p6 = por %p198_p3, %p38_p0 }
  0x10   : > { %1947 = sst [smem:[#allocation11_spill]] %s1539_s22  ;;  %p1549_p8 = por %p204_p7, %p203_p4 }
  0x11   : > { %p1941_p9 = scmp.ge.s32.totalorder %s1440_s16, 2 }
  0x13   : > { %304 = sbr.rel (%p1941_p9) target bundleno = 79 (0x4f), region = 16 }
  0x18   : > { %307 = sbr.rel (!%p1541_p5) target bundleno = 35 (0x23), region = 20  ;;  %s309_s26 = sand.u32 (%p1541_p5), 1, %s1436_s15  }
  0x19   : > { %s1319_s27 = sshll.u32 (%p1541_p5), %s1440_s16, 3  ;;  %s1272_s28 = sshll.u32 (%p1541_p5), %s309_s26, 4 }
  0x1a   : > { %s1951_s0 = sld [smem:[#allocation12_spill]] (%p1541_p5)  ;;  %s311_s12 = scalar_lea.vmem (%p1541_p5), [#allocation2], %s1272_s28 }
  0x20   : > { %s314_s11 = scalar_lea.vmem %s1951_s0, %s1319_s27 }
  0x21   : > { %v345_v0 = vld [vmem:[%s314_s11] sm:$0xff]  ;;  %v347_v1 = vld [vmem:[%s314_s11 + $0x10] sm:$0xff] }
  0x22   : > { %346 = vst [vmem:[%s311_s12] sm:$0xff] %v345_v0  ;;  %348 = vst [vmem:[%s311_s12 + $0x8] sm:$0xff] %v347_v1 }
  0x23 PF: > { %354 = sbr.rel (!%p1541_p5) target bundleno = 46 (0x2e), region = 58  ;;  %s356_s18 = sand.u32 (%p1541_p5), 1, %s1436_s15  }
  0x24   : > { %s1320_s20 = sshll.u32 (%p1541_p5), %s1440_s16, 3  ;;  %s1275_s21 = sshll.u32 (%p1541_p5), %s356_s18, 4 }
  0x25   : > { %s1952_s1 = sld [smem:[#allocation13_spill]] (%p1541_p5)  ;;  %s358_s27 = scalar_lea.vmem (%p1541_p5), [#allocation3], %s1275_s21 }
  0x2b   : > { %s361_s19 = scalar_lea.vmem %s1952_s1, %s1320_s20 }
  0x2c   : > { %v392_v2 = vld [vmem:[%s361_s19] sm:$0xff]  ;;  %v394_v3 = vld [vmem:[%s361_s19 + $0x10] sm:$0xff] }
  0x2d   : > { %393 = vst [vmem:[%s358_s27] sm:$0xff] %v392_v2  ;;  %395 = vst [vmem:[%s358_s27 + $0x8] sm:$0xff] %v394_v3 }
  0x2e PF: > { %401 = sbr.rel (!%p1541_p5) target bundleno = 60 (0x3c), region = 96  ;;  %s403_s28 = sand.u32 (%p1541_p5), 1, %s1436_s15  }
  0x2f   : > { %s1321_s29 = sshll.u32 (%p1541_p5), %s1440_s16, 4  ;;  %s1278_s30 = sshll.u32 (%p1541_p5), %s403_s28, 6 }
  0x30   : > { %s1953_s2 = sld [smem:[#allocation14_spill]] (%p1541_p5)  ;;  %s405_s19 = scalar_lea.vmem (%p1541_p5), [#allocation4], %s1278_s30 }
  0x36   : > { %s408_s18 = scalar_lea.vmem %s1953_s2, %s1321_s29 }
  0x37   : > { %v421_v4 = vld [vmem:[%s408_s18] sm:$0xff]  ;;  %v423_v5 = vld [vmem:[%s408_s18 + $0x8] sm:$0xff] }
  0x38   : > { %v425_v6 = vld [vmem:[%s408_s18 + $0x20] sm:$0xff]  ;;  %422 = vst [vmem:[%s405_s19] sm:$0xff] %v421_v4  ;;  %424 = vst [vmem:[%s405_s19 + $0x8] sm:$0xff] %v423_v5  ;;  %v427_v7 = vld [vmem:[%s408_s18 + $0x28] sm:$0xff] }
  0x39   : > { %426 = vst [vmem:[%s405_s19 + $0x10] sm:$0xff] %v425_v6  ;;  %v429_v8 = vld [vmem:[%s408_s18 + $0x40] sm:$0xff]  ;;  %v431_v9 = vld [vmem:[%s408_s18 + $0x48] sm:$0xff]  ;;  %428 = vst [vmem:[%s405_s19 + $0x18] sm:$0xff] %v427_v7 }
  0x3a   : > { %430 = vst [vmem:[%s405_s19 + $0x20] sm:$0xff] %v429_v8  ;;  %432 = vst [vmem:[%s405_s19 + $0x28] sm:$0xff] %v431_v9  ;;  %v433_v10 = vld [vmem:[%s408_s18 + $0x60] sm:$0xff]  ;;  %v435_v11 = vld [vmem:[%s408_s18 + $0x68] sm:$0xff] }
  0x3b   : > { %434 = vst [vmem:[%s405_s19 + $0x30] sm:$0xff] %v433_v10  ;;  %436 = vst [vmem:[%s405_s19 + $0x38] sm:$0xff] %v435_v11 }
  0x3c PF: > { %442 = sbr.rel (!%p1541_p5) target bundleno = 74 (0x4a), region = 119  ;;  %s444_s22 = sand.u32 (%p1541_p5), 1, %s1436_s15  }
  0x3d   : > { %s1322_s20 = sshll.u32 (%p1541_p5), %s1440_s16, 4  ;;  %s1281_s21 = sshll.u32 (%p1541_p5), %s444_s22, 6 }
  0x3e   : > { %s1954_s3 = sld [smem:[#allocation15_spill]] (%p1541_p5)  ;;  %s446_s29 = scalar_lea.vmem (%p1541_p5), [#allocation5], %s1281_s21 }
  0x44   : > { %s449_s28 = scalar_lea.vmem %s1954_s3, %s1322_s20 }
  0x45   : > { %v462_v12 = vld [vmem:[%s449_s28] sm:$0xff]  ;;  %v464_v13 = vld [vmem:[%s449_s28 + $0x8] sm:$0xff] }
  0x46   : > { %v466_v14 = vld [vmem:[%s449_s28 + $0x20] sm:$0xff]  ;;  %463 = vst [vmem:[%s446_s29] sm:$0xff] %v462_v12  ;;  %465 = vst [vmem:[%s446_s29 + $0x8] sm:$0xff] %v464_v13  ;;  %v468_v15 = vld [vmem:[%s449_s28 + $0x28] sm:$0xff] }
  0x47   : > { %467 = vst [vmem:[%s446_s29 + $0x10] sm:$0xff] %v466_v14  ;;  %v470_v16 = vld [vmem:[%s449_s28 + $0x40] sm:$0xff]  ;;  %v472_v17 = vld [vmem:[%s449_s28 + $0x48] sm:$0xff]  ;;  %469 = vst [vmem:[%s446_s29 + $0x18] sm:$0xff] %v468_v15 }
  0x48   : > { %471 = vst [vmem:[%s446_s29 + $0x20] sm:$0xff] %v470_v16  ;;  %473 = vst [vmem:[%s446_s29 + $0x28] sm:$0xff] %v472_v17  ;;  %v474_v18 = vld [vmem:[%s449_s28 + $0x60] sm:$0xff]  ;;  %v476_v19 = vld [vmem:[%s449_s28 + $0x68] sm:$0xff] }
  0x49   : > { %475 = vst [vmem:[%s446_s29 + $0x30] sm:$0xff] %v474_v18  ;;  %477 = vst [vmem:[%s446_s29 + $0x38] sm:$0xff] %v476_v19 }
  0x4a PF: > { %483 = sbr.rel (!%p1541_p5) target bundleno = 79 (0x4f), region = 142  ;;  %s485_s30 = sand.u32 (%p1541_p5), 1, %s1436_s15  }
  0x4b   : > { %s1323_s11 = sshll.u32 (%p1541_p5), %s1440_s16, 2  ;;  %s1284_s12 = sshll.u32 (%p1541_p5), %s485_s30, 3 }
  0x4c   : > { %s490_s22 = scalar_lea.vmem (%p1541_p5), %s1932_s4, %s1323_s11  ;;  %s487_s20 = scalar_lea.vmem (%p1541_p5), [#allocation6], %s1284_s12 }
  0x4d   : > { %v507_v20 = vld [vmem:[%s490_s22] sm:$0xf] (%p1541_p5)  ;;  %v509_v21 = vld [vmem:[%s490_s22 + $0x8] sm:$0xf] (%p1541_p5) }
  0x4e   : > { %508 = vst [vmem:[%s487_s20] sm:$0xf] (%p1541_p5), %v507_v20  ;;  %510 = vst [vmem:[%s487_s20 + $0x4] sm:$0xf] (%p1541_p5), %v509_v21 }
  0x4f PF: > { %p1287_p10 = scmp.ge.s32.totalorder %s1440_s16, 1  ;;  %p546_p11 = scmp.lt.s32.totalorder %s1440_s16, 3 }
  0x51   : > { %p547_p12 = pnand %p1287_p10, %p546_p11 }
  0x52   : > { %s1594_s23 = sand.u32 (!%p547_p12), 1, %s1432_s14   ;;  %s1294_s21 = sshll.u32 (!%p547_p12), %s1523_s17, 1 }
  0x53   : > { %550 = sbr.rel (%p547_p12) target bundleno = 312 (0x138), region = 187  ;;  %s1288_s26 = sshll.u32 (!%p547_p12), %s1594_s23, 4 }
  0x54   : > { %s1290_s27 = sshll.u32 (!%p547_p12), %s1594_s23, 6  ;;  %s1292_s28 = sshll.u32 (!%p547_p12), %s1594_s23, 3 }
  0x55   : > { %s1293_s29 = sshll.u32 (!%p547_p12), %s1594_s23, 2  ;;  %p645_p13 = scmp.lt.s32.totalorder (!%p547_p12), %s1294_s21, 3 }
  0x56   : > { %s1604_s19 = scalar_lea.vmem (!%p547_p12), [#allocation2], %s1288_s26  ;;  %s1606_s22 = scalar_lea.vmem (!%p547_p12), [#allocation3], %s1288_s26 }
  0x57   : > { %s1608_s20 = scalar_lea.vmem (!%p547_p12), [#allocation4], %s1290_s27  ;;  %s1610_s0 = scalar_lea.vmem (!%p547_p12), [#allocation5], %s1290_s27 }
  0x58   : > { %s1982_s21 = smov (!%p645_p13, %s1294_s21), 3  ;;  %s583_s1 = scalar_lea.vmem [#allocation6], %s1292_s28 }
  0x59   : > { %s1295_s30 = sshll.u32 %s1982_s21, 1  ;;  %s1612_s2 = scalar_lea.vmem [#allocation7], %s1293_s29 }
  0x5a   : > { %s648_s18 = scalar_lea.vmem %s1933_s5, %s1295_s30  ;;  %p1296_p0 = scmp.ne.s32.totalorder %s1523_s17, 0 }
  0x5c   : > { %654 = sbr.rel (%p1296_p0) target bundleno = 100 (0x64), region = 211 }
  0x61   : > { %vm655_vm0 = vcmask 1024   ;;  %v1442_v22 = vmov 0.0  }
  0x62   : > { %656 = vst.msk [vmem:[%s1935_s7] sm:$0x3] %vm655_vm0, %v1442_v22  ;;  %657 = vst.msk [vmem:[%s1936_s8] sm:$0x3] %vm655_vm0, %v1442_v22 }
  0x63   : > { %658 = vst.msk [vmem:[%s1937_s9] sm:$0x3] %vm655_vm0, %v1442_v22  ;;  %659 = vst.msk [vmem:[%s1938_s10] sm:$0x3] %vm655_vm0, %v1442_v22 }
  0x64 PF: > { %v689_v23 = vlaneseq  ;;  %v1627_v24 = vld [vmem:[%s648_s18] sm:$0xf]  ;;  %v1443_v25 = vmov 1966171168   ;;  %v1444_v28 = vmov 1983009808  }
  0x65   : > { %v687_v26 = vunpack.c.l.s4 %v1443_v25  ;;  %v963_v27 = vld [vmem:[%s583_s1] sm:$0xf]  ;;  %v929_v29 = vunpack.c.l.s4 %v1444_v28  ;;  %v1629_v30 = vld [vmem:[%s583_s1 + $0x4] sm:$0xf]  ;;  %vm661_vm1 = vcmp.ne.s32.totalorder %v1627_v24, 0  ;;  %vm865_vm2 = vcmask 1041409  }
  0x66   : > { %v1309_v31 = vrot.slane %v963_v27, 9  ;;  %v1632_v33 = vshrl.u32 %v689_v23, 7  ;;  %v1635_v34 = vrot.slane %v1629_v30, 7  ;;  %v1009_v35 = vrot.slane %v963_v27, 1  ;;  %v667_v55 = vld [vmem:[%s1604_s19] sm:$0xff]  ;;  %v668_v1 = vld [vmem:[%s1604_s19 + $0x8] sm:$0xff] }
  0x67   : > { %v688_v32 = vunpack.c.0.s8 %v687_v26  ;;  %v930_v36 = vunpack.c.0.s8 %v929_v29  ;;  %vm870_vm3 = vcmask 1041408   ;;  %vm1015_vm4 = vcmask 1043459   ;;  %v669_v56 = vld [vmem:[%s1606_s22] sm:$0xff]  ;;  %v670_v2 = vld [vmem:[%s1606_s22 + $0x8] sm:$0xff]  ;;  %s1324_s1 = sshll.u32 %s1523_s17, 6  ;;  %s1096_s3 = sshll.u32 %s1612_s2, 4  ;;  %s1097_s3 = int_to_ptr.vmem [resolvable:$true] %s1096_s3 }
  0x68   : > { %v1638_v37 = vmax.f32 %v963_v27, %v1309_v31  ;;  %v970_v38 = vrot.slane %v1635_v34, 2  ;;  %v1014_v42 = vsel %vm865_vm2, %v1629_v30, %v1009_v35  ;;  %v1445_v43 = vmov 0.0   ;;  %v724_v35 = vld [vmem:[%s1610_s0] sm:$0xff]  ;;  %s1094_s19 = scalar_lea.hbm %s1934_s6, %s1324_s1  ;;  %s1082_s22 = scalar_lea.sflag [#allocation8], %s1594_s23 }
  0x69   : > { %v1642_v39 = vsub.s32 %v930_v36, %v1632_v33  ;;  %v1297_v44 = vsel %vm661_vm1, 1.0, %v1445_v43  ;;  %v1652_v45 = vsub.s32 %v688_v32, %v1632_v33  ;;  %v1655_v46 = vsub.s32 0, %v1632_v33  ;;  %v716_v32 = vld [vmem:[%s1608_s20] sm:$0xff]  ;;  %v717_v36 = vld [vmem:[%s1608_s20 + $0x8] sm:$0xff]  ;;  %s1446_s21 = smov [#allocation7]  }
  0x6a   : > { %v975_v40 = vsub.f32 %v963_v27, %v1638_v37  ;;  %v983_v41 = vrot.slane %v1638_v37, 7  ;;  %v1658_v47 = vmax.f32 %v1629_v30, %v970_v38  ;;  %v1661_v48 = vsub.s32 1, %v1632_v33  ;;  %v725_v38 = vld [vmem:[%s1610_s0 + $0x8] sm:$0xff]  ;;  %s1384_s30 = sshll.u32 %s1446_s21, 4  ;;  %s1385_s30 = int_to_ptr.vmem [resolvable:$false] %s1384_s30 }
  0x6b   : > { %v934_v49 = vrot.slane %v1297_v44, %v1642_v39  ;;  %v1016_v53 = vsel %vm1015_vm4, %v1629_v30, %v1014_v42  ;;  %vm1017_vm5 = vcmask 1045509   ;;  %v1024_v54 = vsel %vm865_vm2, %v1635_v34, %v963_v27  ;;  %v719_v42 = vld [vmem:[%s1608_s20 + $0x18] sm:$0x3]  ;;  %s1386_s11 = scalar_lea.vmem %s1385_s30, 128  ;;  %p1387_p4 = scmp.lt.s32.totalorder %s1097_s3, %s1385_s30 }
  0x6c   : > { %v977_v50 = vmul.f32 1.442695, %v975_v40  ;;  %v987_v51 = vsub.f32 %v963_v27, %v983_v41  ;;  %v984_v52 = vrot.slane %v1658_v47, 7  ;;  %v976_v59 = vsub.f32 %v1629_v30, %v1658_v47  ;;  %v718_v41 = vld [vmem:[%s1608_s20 + $0x10] sm:$0x3] }
  0x6d   : > { %v935_v57 = vcombine.high %v934_v49, %v934_v49  ;;  %v938_v58 = vsel %vm870_vm3, %v934_v49, 0.0  ;;  %v692_v62 = vrot.slane %v1297_v44, %v1652_v45  ;;  %v1018_v0 = vsel %vm1017_vm5, %v1629_v30, %v1016_v53  ;;  %v726_v44 = vld [vmem:[%s1610_s0 + $0x10] sm:$0x3]  ;;  %v727_v53 = vld [vmem:[%s1610_s0 + $0x18] sm:$0x3] }
  0x6e   : > { %v989_v60 = vmul.f32 1.442695, %v987_v51  ;;  %1368 = vpow2.f32 %v977_v50  ;;  %v988_v61 = vsub.f32 %v1629_v30, %v984_v52  ;;  %v671_v3 = vsub.f32 %v667_v55, %v669_v56  ;;  %v720_v52 = vld [vmem:[%s1608_s20 + $0x20] sm:$0xff] }
  0x6f   : > { %v939_v63 = vsel %vm870_vm3, %v935_v57, 0.0  ;;  %vm1019_vm6 = vcmask 1047559   ;;  %v1025_v6 = vsel %vm1015_vm4, %v1635_v34, %v1024_v54  ;;  %v979_v7 = vmul.f32 1.442695, %v976_v59  ;;  %v728_v54 = vld [vmem:[%s1610_s0 + $0x20] sm:$0xff] }
  0x70   : > { %1370 = vpow2.f32 %v989_v60  ;;  %v940_v4 = vadd.f32 %v939_v63, %v938_v58  ;;  %v991_v5 = vmul.f32 1.442695, %v988_v61  ;;  %v693_v8 = vcombine.high %v692_v62, %v692_v62  ;;  %v722_v59 = vld [vmem:[%s1608_s20 + $0x30] sm:$0x3] }
  0x71   : > { %v697_v9 = vrot.slane %v692_v62, %v1655_v46  ;;  %v701_v10 = vrot.slane %v692_v62, %v1661_v48  ;;  %v672_v11 = vsub.f32 %v668_v1, %v670_v2  ;;  %v673_v12 = vand.u32 2147483647, %v671_v3  ;;  %v721_v1 = vld [vmem:[%s1608_s20 + $0x28] sm:$0xff] }
  0x72   : > { %1372 = vpow2.f32 %v991_v5  ;;  %941 = vadd.xlane.f32.xlu1 %v940_v4  ;;  %v677_v13 = vmul.f32 0.5, %v671_v3  ;;  %v1026_v14 = vsel %vm1017_vm5, %v1635_v34, %v1025_v6  ;;  %v705_v15 = vrot.slane %v693_v8, %v1655_v46  ;;  %v729_v2 = vld [vmem:[%s1610_s0 + $0x28] sm:$0xff] }
  0x73   : > { %v709_v16 = vrot.slane %v693_v8, %v1661_v48  ;;  %v710_v17 = vcombine.low %v697_v9, %v701_v10  ;;  %v674_v18 = vand.u32 2147483647, %v672_v11  ;;  %vm1689_vm7 = vcmp.lt.f32.partialorder %v673_v12, 1.0 }
  0x74   : > { %v678_v20 = vmul.f32 0.5, %v672_v11  ;;  %v679_v21 = vmul.f32 %v677_v13, %v671_v3  ;;  %1374 = vpow2.f32 %v979_v7  ;;  %v1020_v22 = vsel %vm1019_vm6, %v1629_v30, %v1018_v0  ;;  %v730_v3 = vld [vmem:[%s1610_s0 + $0x30] sm:$0x3]  ;;  %v723_v7 = vld [vmem:[%s1608_s20 + $0x38] sm:$0x3]  ;;  %s1380_s20 = scalar_lea.vmem %s1097_s3, 64 }
  0x75   : > { %v711_v25 = vcombine.low %v705_v15, %v709_v16  ;;  %v1299_v26 = vadd.f32 -0.5, %v673_v12  ;;  %v1027_v27 = vsel %vm1019_vm6, %v1635_v34, %v1026_v14  ;;  %vm1697_vm8 = vcmp.lt.f32.partialorder %v674_v18, 1.0  ;;  %p1381_p1 = scmp.ne.s32.totalorder %s1097_s3, %s1380_s20  ;;  %p1388_p5 = scmp.lt.s32.totalorder %s1386_s11, %s1380_s20 }
  0x76   : > { %v680_v29 = vmul.f32 %v678_v20, %v672_v11  ;;  %v1300_v31 = vadd.f32 -0.5, %v674_v18  ;;  %vm832_vm9 = vcmask 1043456   ;;  %vm662_vm10 = vcmp.gt.s32.totalorder %v1627_v24, 0 }
  0x77   : > { %v683_v30 = vsel %vm1689_vm7, %v679_v21, %v1299_v26  ;;  %v1715_v49 = vsel %vm661_vm1, %v1020_v22, %v1027_v27  ;;  %v1053_v50 = vsub.s32 2, %v1632_v33  ;;  %v1721_v55 = vsub.f32 %v716_v32, %v724_v35  ;;  %p1382_p2 = pnand %p1381_p1, %p1545_p6  ;;  %p1389_p7 = por %p1388_p5, %p1387_p4 }
  0x78   : > { %v684_v34 = vsel %vm1697_vm8, %v680_v29, %v1300_v31  ;;  %v714_v40 = vmul.f32 %v710_v17, %v683_v30  ;;  %v1727_v58 = vsel %vm662_vm10, 1.0, %v1445_v43  ;;  %v1730_v60 = vsub.f32 %v717_v36, %v725_v38  ;;  %v731_v43 = vld [vmem:[%s1610_s0 + $0x38] sm:$0x3]  ;;  %s1312_s0 = sshll.u32 %s1523_s17, 8 }
  0x79   : > { %v715_v51 = vmul.f32 %v711_v25, %v684_v34  ;;  %v1736_v4 = vsub.f32 %v718_v41, %v726_v44  ;;  %v1741_v8 = vsub.f32 %v719_v42, %v727_v53  ;;  %v1743_v9 = vsub.f32 %v720_v52, %v728_v54  ;;  %p1383_p3 = pneg %p1382_p2 }
  0x7a   : > { %v828_v56 = vcombine.high %v714_v40, %v714_v40  ;;  %v833_v57 = vsel %vm832_vm9, %v714_v40, 0.0  ;;  %v1746_v16 = vsub.f32 %v721_v1, %v729_v2  ;;  %v1748_v17 = vsub.f32 %v722_v59, %v730_v3 }
  0x7b   : > { %v1369_v61 = vpop.eup %1368  ;;  %v829_v62 = vcombine.high %v715_v51, %v715_v51  ;;  %v834_v63 = vrot.slane %v833_v57, 4  ;;  %v847_v0 = vsel %vm832_vm9, %v715_v51, 0.0  ;;  %v1750_v22 = vsub.f32 %v723_v7, %v731_v43  ;;  %p1390_p10 = pnand %p1389_p7, %p1383_p3 }
  0x7c   : > { %v840_v6 = vsel %vm832_vm9, %v828_v56, 0.0  ;;  %v848_v24 = vrot.slane %v847_v0, 4  ;;  %v740_v27 = vand.u32 2147483647, %v1721_v55  ;;  %v741_v28 = vand.u32 2147483647, %v1730_v60 }
  0x7d   : > { %v1371_v5 = vpop.eup %1370  ;;  %v835_v11 = vadd.f32 %v834_v63, %v833_v57  ;;  %v841_v12 = vrot.slane %v840_v6, 4  ;;  %v854_v13 = vsel %vm832_vm9, %v829_v62, 0.0  ;;  %v742_v38 = vand.u32 2147483647, %v1736_v4 }
  0x7e   : > { %v1310_v10 = vrot.slane %v1371_v5, 9  ;;  %v849_v14 = vadd.f32 %v848_v24, %v847_v0  ;;  %v855_v15 = vrot.slane %v854_v13, 4  ;;  %v743_v34 = vand.u32 2147483647, %v1741_v8 }
  0x7f   : > { %v1373_v18 = vpop.eup %1372  ;;  %v836_v20 = vrot.slane %v835_v11, 2  ;;  %v842_v21 = vadd.f32 %v841_v12, %v840_v6  ;;  %v744_v42 = vand.u32 2147483647, %v1743_v9  ;;  %v745_v44 = vand.u32 2147483647, %v1746_v16 }
  0x80   : > { %v1001_v19 = vadd.f32 %v1369_v61, %v1310_v10  ;;  %v850_v25 = vrot.slane %v849_v14, 2  ;;  %v856_v26 = vadd.f32 %v855_v15, %v854_v13  ;;  %v1311_v29 = vrot.slane %v1373_v18, 9 }
  0x81   : > { %v837_v31 = vadd.f32 %v836_v20, %v835_v11  ;;  %v843_v32 = vrot.slane %v842_v21, 2  ;;  %v1375_v35 = vpop.eup %1374  ;;  %v746_v53 = vand.u32 2147483647, %v1748_v17  ;;  %v747_v54 = vand.u32 2147483647, %v1750_v22 }
  0x82   : > { %1376 = vlog2.f32 %v1001_v19  ;;  %v851_v30 = vadd.f32 %v850_v25, %v849_v14  ;;  %v857_v36 = vrot.slane %v856_v26, 2  ;;  %v1002_v56 = vadd.f32 %v1375_v35, %v1311_v29 }
  0x83   : > { %v838_v40 = vrot.slane %v837_v31, 1  ;;  %v844_v41 = vadd.f32 %v843_v32, %v842_v21  ;;  %vm1760_vm11 = vcmp.lt.f32.partialorder %v740_v27, 1.0  ;;  %vm1764_vm12 = vcmp.lt.f32.partialorder %v741_v28, 1.0 }
  0x84   : > { %v852_v51 = vrot.slane %v851_v30, 1  ;;  %v858_v52 = vadd.f32 %v857_v36, %v856_v26  ;;  %vm1768_vm13 = vcmp.lt.f32.partialorder %v742_v38, 1.0  ;;  %vm1772_vm14 = vcmp.lt.f32.partialorder %v743_v34, 1.0 }
  0x85   : > { %v839_v57 = vadd.f32 %v838_v40, %v837_v31  ;;  %v845_v59 = vrot.slane %v844_v41, 1  ;;  %vm1776_vm15 = vcmp.lt.f32.partialorder %v744_v42, 1.0  ;;  %v756_v6 = vmul.f32 0.5, %v1721_v55 }
  0x86   : > { %v853_v62 = vadd.f32 %v852_v51, %v851_v30  ;;  %v859_v63 = vrot.slane %v858_v52, 1  ;;  %vm1782_vm0 = vcmp.lt.f32.partialorder %v745_v44, 1.0  ;;  %v757_v10 = vmul.f32 0.5, %v1730_v60 }
  0x87   : > { %v846_v2 = vadd.f32 %v845_v59, %v844_v41  ;;  %v758_v11 = vmul.f32 0.5, %v1736_v4  ;;  %1378 = vlog2.f32 %v1002_v56  ;;  %vm1789_vm1 = vcmp.lt.f32.partialorder %v746_v53, 1.0 }
  0x88   : > { %v860_v24 = vadd.f32 %v859_v63, %v858_v52  ;;  %v866_v7 = vsel %vm865_vm2, %v853_v62, %v839_v57  ;;  %v759_v14 = vmul.f32 0.5, %v1741_v8  ;;  %v760_v18 = vmul.f32 0.5, %v1743_v9 }
  0x89   : > { %v871_v12 = vsel %vm870_vm3, %v866_v7, 0.0  ;;  %v761_v19 = vmul.f32 0.5, %v1746_v16  ;;  %v762_v20 = vmul.f32 0.5, %v1748_v17  ;;  %vm1799_vm4 = vcmp.lt.f32.partialorder %v747_v54, 1.0 }
  0x8a   : > { %v867_v15 = vsel %vm865_vm2, %v860_v24, %v846_v2  ;;  %v763_v26 = vmul.f32 0.5, %v1750_v22  ;;  %v764_v29 = vmul.f32 %v756_v6, %v1721_v55  ;;  %v765_v32 = vmul.f32 %v757_v10, %v1730_v60 }
  0x8b   : > { %v872_v21 = vsel %vm870_vm3, %v867_v15, 0.0  ;;  %v766_v35 = vmul.f32 %v758_v11, %v1736_v4  ;;  %v1301_v30 = vadd.f32 -0.5, %v740_v27  ;;  %v767_v36 = vmul.f32 %v759_v14, %v1741_v8 }
  0x8c   : > { %v873_v31 = vadd.f32 %v872_v21, %v871_v12  ;;  %v1302_v40 = vadd.f32 -0.5, %v741_v28  ;;  %v1303_v41 = vadd.f32 -0.5, %v742_v38  ;;  %v1304_v51 = vadd.f32 -0.5, %v743_v34 }
  0x8d   : > { %v768_v56 = vmul.f32 %v760_v18, %v1743_v9  ;;  %v769_v57 = vmul.f32 %v761_v19, %v1746_v16  ;;  %v770_v59 = vmul.f32 %v762_v20, %v1748_v17  ;;  %v1305_v55 = vadd.f32 -0.5, %v744_v42 }
  0x8e   : > { %874 = vadd.xlane.f32.xlu0 %v873_v31  ;;  %v771_v60 = vmul.f32 %v763_v26, %v1750_v22  ;;  %v1306_v63 = vadd.f32 -0.5, %v745_v44  ;;  %v1307_v4 = vadd.f32 -0.5, %v746_v53  ;;  %v1308_v27 = vadd.f32 -0.5, %v747_v54 }
  0x8f   : > { %v1377_v52 = vpop.eup %1376  ;;  %v780_v8 = vsel %vm1760_vm11, %v764_v29, %v1301_v30  ;;  %v795_v28 = vrot.slane %v1727_v58, %v1652_v45  ;;  %v952_v9 = vrot.slane %v1727_v58, %v1642_v39  ;;  %v781_v17 = vsel %vm1764_vm12, %v765_v32, %v1302_v40 }
  0x90   : > { %v1004_v62 = vmul.f32 0.6931472, %v1377_v52  ;;  %v782_v22 = vsel %vm1768_vm13, %v766_v35, %v1303_v41  ;;  %v783_v38 = vsel %vm1772_vm14, %v767_v36, %v1304_v51  ;;  %v784_v34 = vsel %vm1776_vm15, %v768_v56, %v1305_v55 }
  0x91   : > { %v796_v42 = vcombine.high %v795_v28, %v795_v28  ;;  %v800_v45 = vrot.slane %v795_v28, %v1655_v46  ;;  %v804_v44 = vrot.slane %v795_v28, %v1661_v48  ;;  %v786_v58 = vsel %vm1789_vm1, %v770_v59, %v1307_v4 }
  0x92   : > { %v1007_v16 = vadd.f32 %v1004_v62, %v1638_v37  ;;  %v785_v37 = vsel %vm1782_vm0, %v769_v57, %v1306_v63  ;;  %v953_v53 = vcombine.high %v952_v9, %v952_v9  ;;  %v787_v54 = vsel %vm1799_vm4, %v771_v60, %v1308_v27 }
  0x93   : > { %v808_v61 = vrot.slane %v796_v42, %v1655_v46  ;;  %v812_v0 = vrot.slane %v796_v42, %v1661_v48  ;;  %v817_v1 = vmul.f32 %v800_v45, %v780_v8  ;;  %v818_v3 = vmul.f32 %v804_v44, %v781_v17 }
  0x94   : > { %v1830_v39 = vsub.f32 %v1007_v16, %v1715_v49  ;;  %v819_v5 = vmul.f32 %v800_v45, %v782_v22  ;;  %v956_v6 = vsel %vm870_vm3, %v952_v9, 0.0  ;;  %v1379_v24 = vpop.eup %1378  ;;  %v820_v7 = vmul.f32 %v804_v44, %v783_v38 }
  0x95   : > { %v821_v43 = vmul.f32 %v808_v61, %v784_v34  ;;  %v822_v10 = vmul.f32 %v812_v0, %v785_v37  ;;  %v823_v11 = vmul.f32 %v808_v61, %v786_v58  ;;  %v824_v12 = vmul.f32 %v812_v0, %v787_v54 }
  0x96   : > { %v1843_v2 = vrot.slane %v1830_v39, %v1053_v50  ;;  %v957_v13 = vsel %vm870_vm3, %v953_v53, 0.0  ;;  %v880_v48 = vsel %vm870_vm3, %v819_v5, 0.0  ;;  %v888_v18 = vsel %vm870_vm3, %v820_v7, 0.0 }
  0x97   : > { %v958_v14 = vadd.f32 %v957_v13, %v956_v6  ;;  %v881_v15 = vadd.f32 %v880_v48, %v817_v1  ;;  %v889_v19 = vadd.f32 %v888_v18, %v818_v3  ;;  %v896_v20 = vsel %vm870_vm3, %v823_v11, 0.0 }
  0x98   : > { %v904_v21 = vsel %vm870_vm3, %v824_v12, 0.0  ;;  %v897_v26 = vadd.f32 %v896_v20, %v821_v43  ;;  %v1006_v9 = vmul.f32 0.6931472, %v1379_v24  ;;  %v1031_v45 = vrot.slane %v1715_v49, 1 }
  0x99   : > { %959 = vadd.xlane.f32.xlu1 %v958_v14  ;;  %v882_v25 = vrot.slane %v881_v15, 4  ;;  %v905_v29 = vadd.f32 %v904_v21, %v822_v10  ;;  %v890_v31 = vrot.slane %v889_v19, 4  ;;  %v1037_v54 = vand.u32 127, %v689_v23 }
  0x9a   : > { %v898_v35 = vrot.slane %v897_v26, 4  ;;  %v1008_v42 = vadd.f32 %v1006_v9, %v1658_v47  ;;  %v1050_v61 = vrot.slane %v1830_v39, %v1655_v46  ;;  %v1040_v47 = vstv %s1312_s0 }
  0x9b   : > { %v883_v32 = vadd.f32 %v882_v25, %v881_v15  ;;  %v906_v30 = vrot.slane %v905_v29, 4  ;;  %v891_v36 = vadd.f32 %v890_v31, %v889_v19  ;;  %v1038_v0 = vadd.s32 128, %v1037_v54 }
  0x9c   : > { %v899_v41 = vadd.f32 %v898_v35, %v897_v26  ;;  %v1035_v53 = vsub.f32 %v1008_v42, %v1031_v45  ;;  %v1041_v1 = vadd.s32 %v1040_v47, %v1037_v54 }
  0x9d   : > { %v884_v40 = vrot.slane %v883_v32, 2  ;;  %v907_v51 = vadd.f32 %v906_v30, %v905_v29  ;;  %v892_v52 = vrot.slane %v891_v36, 2  ;;  %v1042_v49 = vadd.s32 %v1040_v47, %v1038_v0 }
  0x9e   : > { %v900_v57 = vrot.slane %v899_v41, 2  ;;  %v1058_v3 = vrot.slane %v1035_v53, %v1655_v46  ;;  %v1062_v5 = vrot.slane %v1035_v53, %v1053_v50 }
  0x9f   : > { %v885_v56 = vadd.f32 %v884_v40, %v883_v32  ;;  %v908_v59 = vrot.slane %v907_v51, 2  ;;  %v893_v55 = vadd.f32 %v892_v52, %v891_v36  ;;  %vm1044_vm5 = vcmp.lt.s32.totalorder %v1042_v49, 500 }
  0xa0   : > { %v901_v60 = vadd.f32 %v900_v57, %v899_v41  ;;  %v1063_v23 = vsel %vm865_vm2, %v1058_v3, %v1050_v61  ;;  %v1064_v39 = vsel %vm865_vm2, %v1062_v5, %v1843_v2 }
  0xa1   : > { %v886_v62 = vrot.slane %v885_v56, 1  ;;  %v909_v63 = vadd.f32 %v908_v59, %v907_v51  ;;  %v894_v4 = vrot.slane %v893_v55, 1  ;;  %v1068_v24 = vsel %vm1044_vm5, %v1064_v39, 0.0 }
  0xa2   : > { %v902_v8 = vrot.slane %v901_v60, 1 }
  0xa3   : > { %v887_v27 = vadd.f32 %v886_v62, %v885_v56  ;;  %v910_v28 = vrot.slane %v909_v63, 1  ;;  %v895_v16 = vadd.f32 %v894_v4, %v893_v55 }
  0xa4   : > { %v903_v17 = vadd.f32 %v902_v8, %v901_v60 }
  0xa5   : > { %v911_v22 = vadd.f32 %v910_v28, %v909_v63 }
  0xa6   : > { %v916_v38 = vsel %vm865_vm2, %v903_v17, %v887_v27 }
  0xa7   : > { %v917_v34 = vsel %vm865_vm2, %v911_v22, %v895_v16  ;;  %v920_v44 = vsel %vm870_vm3, %v916_v38, 0.0 }
  0xa8   : > { %v921_v37 = vsel %vm870_vm3, %v917_v34, 0.0  ;;  %vm1043_vm3 = vcmp.lt.s32.totalorder %v1041_v1, 500 }
  0xa9   : > { %v922_v58 = vadd.f32 %v921_v37, %v920_v44  ;;  %v1067_v6 = vsel %vm1043_vm3, %v1063_v23, 0.0 }
  0xaa   : > { %v1071_v7 = vcombine.low %v1067_v6, %v1068_v24 }
  0xab   : > { %923 = vadd.xlane.f32.xlu0 %v922_v58 }
  0xac   : > { %1313 = vst.sshfl [vmem:[%s1612_s2] sm:$0x33 pattern:$0x76325410] %v1071_v7 }
  0xad   : > { %1393 = shalt.err (!%p1390_p10)
}
  0xae   : > { %s1394_s2 = scalar_lea.hbm %s1094_s19, 64  ;;  %s1398_s26 = scalar_lea.hbm %s1934_s6, 128 }
  0xaf   : > { %p1395_p11 = scmp.ne.s32.totalorder %s1094_s19, %s1394_s2  ;;  %p1399_p0 = scmp.lt.s32.totalorder %s1094_s19, %s1934_s6 }
  0xb0   : > { %p1400_p1 = scmp.lt.s32.totalorder %s1398_s26, %s1394_s2 }
  0xb1   : > { %p1396_p12 = pnand %p1395_p11, %p1545_p6 }
  0xb2   : > { %p1401_p2 = por %p1400_p1, %p1399_p0 }
  0xb3   : > { %p1397_p13 = pneg %p1396_p12 }
  0xb5   : > { %p1402_p9 = pnand %p1401_p2, %p1397_p13 }
  0xb7   : > { %1405 = shalt.err (!%p1402_p9)
}
  0xb8   : > { %1325 = dma.vmem_to_hbm [thread:$0]  (%p1545_p6), %s1097_s3, 64, %s1094_s19, %s1082_s22   ;;  %v927_v33 = vld [vmem:[%s1935_s7] sm:$0x3]  ;;  %vm877_vm2 = vcmask 1024  }
  0xb9   : > { %v825_v2 = vld [vmem:[%s1937_s9] sm:$0x3] }
  0xba   : > { %v945_v11 = vld [vmem:[%s1936_s8] sm:$0x3] }
  0xbb   : > { %v879_v48 = vld [vmem:[%s1938_s10] sm:$0x3] }
  0xfb   : > { %v942_v46 = vpop.xlane.xlu1 %941 }
  0xfc   : > { %v943_v50 = vadd.f32 %v942_v46, %v927_v33 }
  0xfe   : > { %944 = vst.msk [vmem:[%s1935_s7] sm:$0x3] %vm877_vm2, %v943_v50 }
 0x117   : > { %v875_v43 = vpop.xlane.xlu0 %874 }
 0x118   : > { %v876_v10 = vadd.f32 %v875_v43, %v825_v2 }
 0x11a   : > { %878 = vst.msk [vmem:[%s1937_s9] sm:$0x3] %vm877_vm2, %v876_v10 }
 0x122   : > { %v960_v12 = vpop.xlane.xlu1 %959 }
 0x123   : > { %v961_v13 = vadd.f32 %v960_v12, %v945_v11 }
 0x125   : > { %962 = vst.msk [vmem:[%s1936_s8] sm:$0x3] %vm877_vm2, %v961_v13 }
 0x134   : > { %v924_v14 = vpop.xlane.xlu0 %923 }
 0x135   : > { %v925_v15 = vadd.f32 %v924_v14, %v879_v48 }
 0x137   : > { %926 = vst.msk [vmem:[%s1938_s10] sm:$0x3] %vm877_vm2, %v925_v15 }
 0x138 PF: > { %s1132_s26 = sand.u32 1, %s1428_s13   ;;  %p1975_p6 = scmp.ge.s32.totalorder %s1440_s16, 2 }
 0x139   : > { %s1133_s12 = scalar_lea.sflag [#allocation8], %s1132_s26 }
 0x13a   : > { %p1328_p9 = pnand %p1975_p6, %p1549_p8 }
 0x13c   : > { %p1329_p3 = pneg %p1328_p9 }
 0x13e   : > { %1423 = dma.done.wait (%p1329_p3), %s1133_s12, 64  }
 0x13f   : > { %1425 = vsyncadd (%p1329_p3), %s1133_s12, 4294967232  ;;  %s1976_s16 = sld [smem:[#allocation10_spill]]  ;;  %s1978_s13 = smov %s1432_s14 }
 0x140   : > { %s1977_s27 = sld [smem:[#allocation11_spill]]  ;;  %s1979_s14 = smov %s1436_s15 }
 0x145   : > { %p21_p4 = scmp.ge.s32.totalorder %s1976_s16, 4  }
 0x146   : > { %s1980_s15 = smov %s1977_s27 }
 0x147   :  { %23 = sbr.rel (!%p21_p4) target bundleno = 8 (0x8), region = 318 }
 0x14c   :  { %1138 = vsyncpa [#allocation8], 1 }
 0x14d   :  { %1140 = vsyncpa [#allocation8 + $0x1], 1 }

</bundles_post_ra>
